<compile_context>
chip_gen: v6e
topology: v6e:2x2x1
jax: 0.10.0
libtpu: 0.0.40
codegen_flags: <defaults>
</compile_context>

<pallas_src>
import jax
import jax.numpy as jnp
from jax.experimental import pallas as pl
from jax.experimental.pallas import tpu as pltpu


def mlp_kernel(params_ref, x_ref, o_ref):
    # x_ref : (F, TB)      activations, batch in the lane axis (lane-dense)
    # params: (F+2, F+1)   rows 0:F   = [ W1 | b1 ]   (PyTorch (out,in) layout)
    #                      rows F:F+2 = [ W2 | b2 ]
    F = x_ref.shape[0]
    w1 = params_ref[0:F, 0:F]            # (F, F)
    b1 = params_ref[0:F, F:F + 1]        # (F, 1)
    w2 = params_ref[F:F + 2, 0:F]        # (2, F)
    b2 = params_ref[F:F + 2, F:F + 1]    # (2, 1)

    x = x_ref[...]                                                    # (F, TB)
    h = jnp.dot(w1, x, preferred_element_type=jnp.float32) + b1       # (F, TB)
    h = jnp.maximum(h, 0.0)                                           # ReLU
    # TODO(synk): nn.Dropout(0.3) is identity at inference; training-mode dropout
    #             (random mask + 1/(1-p) scale) is not implemented here.
    out = jnp.dot(w2, h, preferred_element_type=jnp.float32) + b2     # (2, TB)
    o_ref[...] = out.astype(o_ref.dtype)


def pack_params(w1, b1, w2, b2):
    """Pack PyTorch-layout (out,in) weights + biases into one (F+2, F+1) block."""
    F = w1.shape[0]
    params = jnp.zeros((F + 2, F + 1), jnp.float32)
    params = params.at[0:F, 0:F].set(w1)
    params = params.at[0:F, F].set(b1)
    params = params.at[F:F + 2, 0:F].set(w2)
    params = params.at[F:F + 2, F].set(b2)
    return params


def mlp_forward(x, w1, b1, w2, b2, feature_type=0, block_batch=2048):
    """Reproduce MLP.forward (eval mode). x is (B, num_raw_features), PyTorch layout."""
    # Feature selection. For feature_type==0 the split + re-concat of cols [0:6]
    # and [6:] is exactly the input, so it is skipped (removes a full HBM copy).
    if feature_type == 0:
        feats = x
    elif feature_type == 1:
        feats = x[:, 0:6]
    else:
        feats = x[:, 6:]

    B, F = feats.shape
    # Layout plumbing: put batch in the lane axis so the kernel streams
    # lane-dense (F, TB) tiles and writes lane-dense (2, TB) tiles.
    x_t = feats.T                      # (F, B)
    params = pack_params(w1, b1, w2, b2)

    tb = B if B <= block_batch else block_batch   # block last dim: full dim or multiple of 128
    grid = (pl.cdiv(B, tb),)

    out_t = pl.pallas_call(
        mlp_kernel,
        out_shape=jax.ShapeDtypeStruct((2, B), jnp.float32),
        grid=grid,
        in_specs=[
            pl.BlockSpec((F + 2, F + 1), lambda i: (0, 0)),   # packed params, VMEM-resident
            pl.BlockSpec((F, tb), lambda i: (0, i)),          # activation stream over batch
        ],
        out_specs=pl.BlockSpec((2, tb), lambda i: (0, i)),
        compiler_params=pltpu.CompilerParams(
            dimension_semantics=("parallel",)),               # megacore-shard batch on v7x
    )(params, x_t)
    return out_t.T                     # back to (B, 2), matching the PyTorch module


def init_params(key, feature_type=0):
    # nn.Linear-style init; weights kept in PyTorch (out, in) layout.
    dims = {0: 14, 1: 6, 2: 8}[feature_type]
    k1, k2, k3, k4 = jax.random.split(key, 4)
    bound = 1.0 / jnp.sqrt(dims)
    w1 = jax.random.uniform(k1, (dims, dims), jnp.float32, -bound, bound)
    b1 = jax.random.uniform(k2, (dims,), jnp.float32, -bound, bound)
    w2 = jax.random.uniform(k3, (2, dims), jnp.float32, -bound, bound)
    b2 = jax.random.uniform(k4, (2,), jnp.float32, -bound, bound)
    return w1, b1, w2, b2


def _ref(x, w1, b1, w2, b2):
    # Pure-JAX reference (eval mode => dropout is identity), PyTorch semantics.
    return jnp.maximum(x @ w1.T + b1, 0.0) @ w2.T + b2


if __name__ == "__main__":
    key = jax.random.PRNGKey(0)
    k_in, k_in2, k_params = jax.random.split(key, 3)

    w1, b1, w2, b2 = init_params(k_params, feature_type=0)

    # Small shape consistent with the module: batch=8, 14 features.
    batch = 8
    x = jax.random.normal(k_in, (batch, 14), jnp.float32)
    out = jax.block_until_ready(mlp_forward(x, w1, b1, w2, b2, feature_type=0))
    assert out.shape == (batch, 2)
    assert jnp.allclose(out, _ref(x, w1, b1, w2, b2), atol=1e-5, rtol=1e-5)

    # Exercise the multi-block (grid > 1) path as well.
    batch2 = 256
    x2 = jax.random.normal(k_in2, (batch2, 14), jnp.float32)
    out2 = jax.block_until_ready(
        mlp_forward(x2, w1, b1, w2, b2, feature_type=0, block_batch=128))
    assert out2.shape == (batch2, 2)
    assert jnp.allclose(out2, _ref(x2, w1, b1, w2, b2), atol=1e-5, rtol=1e-5)

    print("KERNEL_OK")
</pallas_src>

<mosaic_0001>
module attributes {stable_mosaic.version = 11 : i64} {
  func.func @mlp_kernel(%arg0: i32, %arg1: memref<16x15xf32, #tpu.memory_space<vmem>>, %arg2: memref<14x8xf32, #tpu.memory_space<vmem>>, %arg3: memref<2x8xf32, #tpu.memory_space<vmem>>) attributes {dimension_semantics = [#tpu.dimension_semantics<parallel>], iteration_bounds = array<i64: 1>, scalar_prefetch = 0 : i64, scratch_operands = 0 : i64, tpu.core_type = #tpu.core_type<tc>, window_params = [{pipeline_mode = #tpu.pipeline_mode<synchronous>, transform_indices = @transform_0, window_bounds = array<i64: 16, 15>}, {transform_indices = @transform_1, window_bounds = array<i64: 14, 8>}, {transform_indices = @transform_2, window_bounds = array<i64: 2, 8>}]} {
    %c0 = arith.constant 0 : index
    %c0_0 = arith.constant 0 : index
    %0 = vector.load %arg1[%c0, %c0_0] : memref<16x15xf32, #tpu.memory_space<vmem>>, vector<14x14xf32>
    %c0_1 = arith.constant 0 : index
    %c14 = arith.constant 14 : index
    %1 = vector.load %arg1[%c0_1, %c14] : memref<16x15xf32, #tpu.memory_space<vmem>>, vector<14x1xf32>
    %c14_2 = arith.constant 14 : index
    %c0_3 = arith.constant 0 : index
    %2 = vector.load %arg1[%c14_2, %c0_3] : memref<16x15xf32, #tpu.memory_space<vmem>>, vector<2x14xf32>
    %c14_4 = arith.constant 14 : index
    %c14_5 = arith.constant 14 : index
    %3 = vector.load %arg1[%c14_4, %c14_5] : memref<16x15xf32, #tpu.memory_space<vmem>>, vector<2x1xf32>
    %c0_6 = arith.constant 0 : index
    %c0_7 = arith.constant 0 : index
    %4 = vector.load %arg2[%c0_6, %c0_7] : memref<14x8xf32, #tpu.memory_space<vmem>>, vector<14x8xf32>
    %cst = arith.constant dense<0.000000e+00> : vector<14x8xf32>
    %5 = tpu.matmul %0, %4, %cst {dimension_numbers = #tpu.dot_dimension_numbers<[1], [0], [0], [1], [0, 0, 1, 1], [], []>} : vector<14x14xf32>, vector<14x8xf32>, vector<14x8xf32> -> vector<14x8xf32>
    %6 = vector.broadcast %1 : vector<14x1xf32> to vector<14x8xf32>
    %7 = arith.addf %5, %6 : vector<14x8xf32>
    %cst_8 = arith.constant 0.000000e+00 : f32
    %8 = vector.broadcast %cst_8 : f32 to vector<14x8xf32>
    %9 = arith.maximumf %7, %8 : vector<14x8xf32>
    %cst_9 = arith.constant dense<0.000000e+00> : vector<2x8xf32>
    %10 = tpu.matmul %2, %9, %cst_9 {dimension_numbers = #tpu.dot_dimension_numbers<[1], [0], [0], [1], [0, 0, 1, 1], [], []>} : vector<2x14xf32>, vector<14x8xf32>, vector<2x8xf32> -> vector<2x8xf32>
    %11 = vector.broadcast %3 : vector<2x1xf32> to vector<2x8xf32>
    %12 = arith.addf %10, %11 : vector<2x8xf32>
    %c0_10 = arith.constant 0 : index
    %c0_11 = arith.constant 0 : index
    %13 = vector.load %arg3[%c0_10, %c0_11] : memref<2x8xf32, #tpu.memory_space<vmem>>, vector<2x8xf32>
    tpu.vector_store %arg3[%c0_10, %c0_11], %12 {strides = array<i32>} : memref<2x8xf32, #tpu.memory_space<vmem>>, vector<2x8xf32>,
    return
  }
  func.func @transform_0(%arg0: i32) -> (i32, i32) {
    %c0_i32 = arith.constant 0 : i32
    %c0_i32_0 = arith.constant 0 : i32
    %c0_i32_1 = arith.constant 0 : i32
    return %c0_i32, %c0_i32_0 : i32, i32
  }
  func.func @transform_1(%arg0: i32) -> (i32, i32) {
    %c0_i32 = arith.constant 0 : i32
    %c0_i32_0 = arith.constant 0 : i32
    return %c0_i32, %arg0 : i32, i32
  }
  func.func @transform_2(%arg0: i32) -> (i32, i32) {
    %c0_i32 = arith.constant 0 : i32
    %c0_i32_0 = arith.constant 0 : i32
    return %c0_i32, %arg0 : i32, i32
  }
}

</mosaic_0001>

<bundles_post_ra>
// kernel: tpu_custom_call.1
= control target key start
LH: loop header
LB: loop body
LE: loop exit
PB: predicated region body
PF: predicated region fallthrough
CT: control target
= control target key end

     0   :  { %vm32_vm0 = vcmask 1045504   ;;  %vm27_vm1 = vcmask 113664   ;;  %s306_s0 = inlined_call_operand.vmem [shape: f32[16,15], index: 0, kind: input, shape index: {}]   ;;  %s307_s1 = inlined_call_operand.vmem [shape: f32[14,8], index: 1, kind: input, shape index: {}]   ;;  %s308_s2 = inlined_call_operand.hbm [shape: f32[2,8], index: 2, kind: output, shape index: {}]  }
   0x1   :  { %v16_v0 = vld [vmem:[%s307_s1 + $0x8] sm:$0x3f]  ;;  %v15_v1 = vld [vmem:[%s307_s1] sm:$0xff] }
   0x2   :  { %v12_v2 = vld [vmem:[%s306_s0] sm:$0xff]  ;;  %221 = vmatprep.subr.msk.mxu0 %vm32_vm0, %v16_v0 }
   0x3   :  { %225 = vmatprep.mubr.msk.f32.mxu0 %vm27_vm1, %v12_v2 }
   0x4   :  { %7 = vsyncpa [#allocation3], 0  ;;  %222 = vmatpush3.msk.msra.mxu0 %vm32_vm0, %v16_v0  ;;  %v13_v3 = vld [vmem:[%s306_s0 + $0x8] sm:$0x3f]  ;;  %v263_v4 = vmov 14   ;;  %v264_v5 = vmov 0.0  }
   0x5   :  { %239 = vset.pattern.permute.xlu0 %v263_v4  ;;  %223 = vmatprep.subr.mxu0 %v15_v1  ;;  %vm265_vm2 = vmmov 0   ;;  %v14_v6 = vld [vmem:[%s306_s0 + $0xe] sm:$0x3]  ;;  %s266_s18 = smov [#allocation2]   ;;  %vm193_vm3 = vcmask 58368  }
   0x6   :  { %24 = vperm.xlu0 %239, %v13_v3   ;;  %224 = vmatpush3.msra.mxu0 %v15_v1  ;;  %s201_s19 = sshll.u32 %s266_s18, 4  ;;  %s202_s19 = int_to_ptr.vmem [resolvable:$true] %s201_s19 }
   0x7   :  { %240 = vset.pattern.permute.xlu1 %v263_v4  ;;  %226 = vmatmul.mubr.msk.f32.vlgmr.msra.gmra.mxu0 %vm27_vm1, %v13_v3  ;;  %s241_s0 = scalar_lea.vmem %s202_s19, 32  ;;  %p246_p1 = scmp.lt.s32.totalorder %s202_s19, %s202_s19 }
   0x8   :  { %228 = vmatprep.subr.mxu1 %v264_v5  ;;  %232 = vmatprep.mubr.msk.f32.mxu1 %vm265_vm2, %v264_v5  ;;  %p242_p0 = scmp.ne.s32.totalorder %s202_s19, %s241_s0  ;;  %p247_p2 = scmp.lt.s32.totalorder %s241_s0, %s241_s0 }
   0x9   :  { %115 = vperm.xlu1 %240, %v14_v6  }
   0xa   :  { %19 = vperm.xlu0 %239, %v12_v2   ;;  %p248_p3 = por %p247_p2, %p246_p1 }
   0xc   :  { %p249_p4 = pnand %p248_p3, %p242_p0 }
  0x81   :  { %v25_v7 = vpop.permute.xlu0 %24 }
  0x84   :  { %v116_v15 = vpop.permute.xlu1 %115 }
  0x85   :  { %v20_v10 = vpop.permute.xlu0 %19 }
  0xc7   :  { %v227_v8 = vpop.f32.mrf.mxu0 }
  0xc8   :  { %v108_v9 = vadd.f32 %v227_v8, %v25_v7 }
  0xc9   :  { %v102_v11 = vpop.f32.mrf.mxu0 }
  0xca   :  { %v112_v12 = vmax.f32 %v108_v9, 0.0  ;;  %v103_v13 = vadd.f32 %v102_v11, %v20_v10 }
  0xcc   :  { %v111_v14 = vmax.f32 %v103_v13, 0.0  ;;  %229 = vmatpush3.msk.msra.mxu1 %vm32_vm0, %v112_v12 }
  0xcd   :  { %230 = vmatprep.subr.mxu1 %v264_v5 }
  0xce   :  { %231 = vmatpush3.msra.mxu1 %v111_v14 }
  0xcf   :  { %233 = vmatmul.mubr.msk.f32.vlgmr.msra.gmra.mxu1 %vm27_vm1, %v14_v6 }
 0x18f   :  { %v189_v16 = vpop.f32.mrf.mxu1 }
 0x190   :  { %v190_v17 = vadd.f32 %v189_v16, %v116_v15 }
 0x191   :  { %v234_v18 = vpop.f32.mrf.mxu1 }
 0x192   :  { %194 = vst.msk [vmem:[#allocation2] sm:$0x3] %vm193_vm3, %v190_v17 }
 0x193   :  { %252 = shalt.err (!%p249_p4)
}
 0x194   :  { %204 = dma.vmem_to_hbm [thread:$0]  %s202_s19, 32, %s308_s2, [#allocation3]  }
 0x195   :  { %261 = dma.done.wait [#allocation3], 32  }
 0x196   :  { %262 = vsyncadd [#allocation3], 4294967264 }
 0x197   :  { %208 = vsyncpa [#allocation3], 1 }

</bundles_post_ra>
